<compile_context>
chip_gen: v6e
topology: v6e:2x2x1
jax: 0.10.0
libtpu: 0.0.40
codegen_flags: <defaults>
</compile_context>

<pallas_src>
import jax
import jax.numpy as jnp
from jax.experimental import pallas as pl
from jax.experimental.pallas import tpu as pltpu


_VMEM_LIMIT = 32 * 1024 * 1024        # explicit scoped-VMEM budget, safe on v5e/v6e/v7x
_TILE_TARGET_BYTES = 4 * 1024 * 1024  # per-block target (lane-padded) for the tiled path
_FUSED_SLAB_LIMIT = 3 * 1024 * 1024   # per-batch padded (C, HW) slab budget for fusion


def _make_divisible(v, divisor, min_value=None):
    if min_value is None:
        min_value = divisor
    new_v = max(min_value, int(v + divisor / 2) // divisor * divisor)
    if new_v < 0.9 * v:
        new_v += divisor
    return new_v


def _round_up(x, m):
    return ((x + m - 1) // m) * m


# ---------------------------------------------------------------------------
# Fused kernel (primary path): pool + FC1 + ReLU + FC2 + h_sigmoid + rescale
# ---------------------------------------------------------------------------
def _fused_se_kernel(x_ref, w1_ref, b1_ref, w2_ref, b2_ref, o_ref):
    x = x_ref[0]                                            # (C, HW), native dtype
    hw = x.shape[-1]
    # squeeze: per-channel mean, f32 accumulation
    pooled = jnp.sum(x.astype(jnp.float32), axis=-1, keepdims=True) * (1.0 / hw)  # (C, 1)
    # excite: (hidden, C) @ (C, 1) -> relu -> (C, hidden) @ (hidden, 1) -> h_sigmoid
    h = jnp.dot(w1_ref[...], pooled, preferred_element_type=jnp.float32) + b1_ref[...]
    h = jnp.maximum(h, 0.0)                                 # (hidden, 1)
    g = jnp.dot(w2_ref[...], h, preferred_element_type=jnp.float32) + b2_ref[...]
    scale = jnp.clip(g + 3.0, 0.0, 6.0) * (1.0 / 6.0)       # (C, 1) f32
    # rescale in the input dtype (bf16 stays bf16 on v6e/v7x VPUs)
    o_ref[0] = (x * scale.astype(x.dtype)).astype(o_ref.dtype)


def _se_layer_fused(x, w1, b1, w2, b2):
    b, c, h, w = x.shape
    hidden = w1.shape[0]
    hw = h * w
    itemsize = jnp.dtype(x.dtype).itemsize
    n = x.size
    x3 = x.reshape(b, c, hw)                                # metadata-only reshape

    out = pl.pallas_call(
        _fused_se_kernel,
        out_shape=jax.ShapeDtypeStruct((b, c, hw), x.dtype),
        grid_spec=pltpu.PrefetchScalarGridSpec(
            num_scalar_prefetch=0,
            grid=(b,),
            in_specs=[
                pl.BlockSpec((1, c, hw), lambda i: (i, 0, 0)),     # x[b]
                pl.BlockSpec((hidden, c), lambda i: (0, 0)),       # w1 (resident)
                pl.BlockSpec((hidden, 1), lambda i: (0, 0)),       # b1
                pl.BlockSpec((c, hidden), lambda i: (0, 0)),       # w2
                pl.BlockSpec((c, 1), lambda i: (0, 0)),            # b2
            ],
            out_specs=pl.BlockSpec((1, c, hw), lambda i: (i, 0, 0)),
        ),
        compiler_params=pltpu.CompilerParams(
            dimension_semantics=("parallel",),
            vmem_limit_bytes=_VMEM_LIMIT),
        cost_estimate=pl.CostEstimate(
            flops=2 * n + 4 * b * hidden * c,
            transcendentals=0,
            bytes_accessed=2 * n * itemsize),
    )(
        x3,
        w1.astype(jnp.float32),
        b1.reshape(hidden, 1).astype(jnp.float32),
        w2.astype(jnp.float32),
        b2.reshape(c, 1).astype(jnp.float32),
    )
    return out.reshape(b, c, h, w)


# ---------------------------------------------------------------------------
# Tiled fallback kernels (only when a per-batch slab does not fit VMEM)
# ---------------------------------------------------------------------------
def _pool_kernel(x_ref, o_ref):
    """Row-wise mean over the lane (H*W) axis, f32 accumulation."""
    x = x_ref[...].astype(jnp.float32)                      # (tile_r, HW)
    o_ref[...] = jnp.sum(x, axis=-1, keepdims=True) * (1.0 / x.shape[-1])


def _scale_kernel(x_ref, s_ref, o_ref):
    """out[r, :] = x[r, :] * scale[r]  (lane broadcast of a (tile_r, 1) column)."""
    x = x_ref[...]                                          # (tile_r, HW), native dtype
    s = s_ref[...]                                          # (tile_r, 1) f32
    o_ref[...] = (x * s.astype(x.dtype)).astype(o_ref.dtype)


def _pick_tile_rows(n_rows, n_cols, itemsize, target_bytes=_TILE_TARGET_BYTES):
    """Rows per block: multiple of 8, VMEM-accounted with the 128-lane padding,
    capped so the grid has >= 2 steps whenever n_rows > 8 (v7x megacore +
    double-buffering).  The final block may be ragged; Pallas masks it."""
    cols_padded = _round_up(n_cols, 128)
    row_bytes = max(1, cols_padded * itemsize)
    rows = max(8, (target_bytes // row_bytes) // 8 * 8)
    if n_rows > 8:
        cap = max(8, _round_up(pl.cdiv(n_rows, 2), 8))
        if cap >= n_rows:
            cap = max(8, (n_rows - 1) // 8 * 8)
        rows = min(rows, cap)
    rows = min(rows, _round_up(n_rows, 8))
    return int(rows)


def _se_layer_tiled(x, w1, b1, w2, b2):
    b, c, h, w = x.shape
    hw = h * w
    bc = b * c
    itemsize = jnp.dtype(x.dtype).itemsize
    x2d = x.reshape(bc, hw)                                 # metadata-only reshape

    tile_r = _pick_tile_rows(bc, hw, itemsize)
    grid_r = pl.cdiv(bc, tile_r)

    # ---- squeeze: global average pool over H*W -------------------------------
    pooled = pl.pallas_call(
        _pool_kernel,
        out_shape=jax.ShapeDtypeStruct((bc, 1), jnp.float32),
        grid_spec=pltpu.PrefetchScalarGridSpec(
            num_scalar_prefetch=0,
            grid=(grid_r,),
            in_specs=[pl.BlockSpec((tile_r, hw), lambda i: (i, 0))],
            out_specs=pl.BlockSpec((tile_r, 1), lambda i: (i, 0)),
        ),
        compiler_params=pltpu.CompilerParams(
            dimension_semantics=("parallel",),
            vmem_limit_bytes=_VMEM_LIMIT),
        cost_estimate=pl.CostEstimate(
            flops=bc * hw, transcendentals=0,
            bytes_accessed=bc * hw * itemsize + bc * 4),
    )(x2d)

    # ---- excite: the FCs are tiny (hidden ~8-240); pure dispatch latency in a
    # dedicated kernel, so let XLA execute them as plain ops.
    y = pooled.reshape(b, c)
    y = jnp.maximum(y @ w1.T.astype(jnp.float32) + b1.astype(jnp.float32), 0.0)
    y = jnp.clip(y @ w2.T.astype(jnp.float32) + b2.astype(jnp.float32) + 3.0,
                 0.0, 6.0) * (1.0 / 6.0)
    scale2d = y.reshape(bc, 1)

    # ---- rescale: x * y broadcast per (b, c) row ------------------------------
    n = x.size
    out2d = pl.pallas_call(
        _scale_kernel,
        out_shape=jax.ShapeDtypeStruct((bc, hw), x.dtype),
        grid_spec=pltpu.PrefetchScalarGridSpec(
            num_scalar_prefetch=0,
            grid=(grid_r,),
            in_specs=[pl.BlockSpec((tile_r, hw), lambda i: (i, 0)),
                      pl.BlockSpec((tile_r, 1), lambda i: (i, 0))],
            out_specs=pl.BlockSpec((tile_r, hw), lambda i: (i, 0)),
        ),
        compiler_params=pltpu.CompilerParams(
            dimension_semantics=("parallel",),
            vmem_limit_bytes=_VMEM_LIMIT),
        cost_estimate=pl.CostEstimate(
            flops=n, transcendentals=0,
            bytes_accessed=2 * n * itemsize),
    )(x2d, scale2d)

    return out2d.reshape(b, c, h, w)


# ---------------------------------------------------------------------------
# Public entry point
# ---------------------------------------------------------------------------
def se_layer(x, w1, b1, w2, b2, *, force_tiled=False):
    """x: (B, C, H, W); w1: (hidden, C); b1: (hidden,); w2: (C, hidden); b2: (C,)."""
    b, c, h, w = x.shape
    hw = h * w
    itemsize = jnp.dtype(x.dtype).itemsize
    slab_padded = _round_up(c, 8) * _round_up(hw, 128) * itemsize
    if (not force_tiled) and slab_padded <= _FUSED_SLAB_LIMIT:
        return _se_layer_fused(x, w1, b1, w2, b2)
    return _se_layer_tiled(x, w1, b1, w2, b2)


# ---------------------------------------------------------------------------
# Pure-JAX reference
# ---------------------------------------------------------------------------
def se_layer_ref(x, w1, b1, w2, b2):
    y = jnp.mean(x.astype(jnp.float32), axis=(2, 3))          # (B, C)
    y = jnp.maximum(y @ w1.T.astype(jnp.float32) + b1, 0.0)
    y = jnp.clip(y @ w2.T.astype(jnp.float32) + b2 + 3.0, 0.0, 6.0) / 6.0
    return (x.astype(jnp.float32) * y[:, :, None, None]).astype(x.dtype)


if __name__ == "__main__":
    key = jax.random.PRNGKey(0)
    B, C, H, W = 2, 4, 16, 16
    reduction = 4
    hidden = _make_divisible(C // reduction, 8)                # -> 8

    k1, k2, k3, k4, k5 = jax.random.split(key, 5)
    x = jax.random.normal(k1, (B, C, H, W), dtype=jnp.float32) * 2.0
    w1 = jax.random.normal(k2, (hidden, C), dtype=jnp.float32) * 0.5
    b1 = jax.random.normal(k3, (hidden,), dtype=jnp.float32) * 0.1
    w2 = jax.random.normal(k4, (C, hidden), dtype=jnp.float32) * 0.5
    b2 = jax.random.normal(k5, (C,), dtype=jnp.float32) * 0.1

    ref = se_layer_ref(x, w1, b1, w2, b2)

    # primary (fused) path
    out = jax.block_until_ready(se_layer(x, w1, b1, w2, b2))
    assert out.shape == x.shape and out.dtype == x.dtype
    assert jnp.allclose(out, ref, atol=1e-4, rtol=1e-4), \
        float(jnp.max(jnp.abs(out - ref)))

    # tiled fallback path (exercised explicitly so it stays correct)
    out_t = jax.block_until_ready(se_layer(x, w1, b1, w2, b2, force_tiled=True))
    assert jnp.allclose(out_t, ref, atol=1e-4, rtol=1e-4), \
        float(jnp.max(jnp.abs(out_t - ref)))

    print("KERNEL_OK")
</pallas_src>

<mosaic_0001>
module attributes {stable_mosaic.version = 11 : i64} {
  func.func @_fused_se_kernel(%arg0: i32, %arg1: memref<1x4x256xf32, #tpu.memory_space<vmem>>, %arg2: memref<8x4xf32, #tpu.memory_space<vmem>>, %arg3: memref<8x1xf32, #tpu.memory_space<vmem>>, %arg4: memref<4x8xf32, #tpu.memory_space<vmem>>, %arg5: memref<4x1xf32, #tpu.memory_space<vmem>>, %arg6: memref<1x4x256xf32, #tpu.memory_space<vmem>>) attributes {dimension_semantics = [#tpu.dimension_semantics<parallel>], iteration_bounds = array<i64: 2>, scalar_prefetch = 0 : i64, scratch_operands = 0 : i64, tpu.core_type = #tpu.core_type<tc>, window_params = [{transform_indices = @transform_0, window_bounds = array<i64: 1, 4, 256>}, {pipeline_mode = #tpu.pipeline_mode<synchronous>, transform_indices = @transform_1, window_bounds = array<i64: 8, 4>}, {pipeline_mode = #tpu.pipeline_mode<synchronous>, transform_indices = @transform_2, window_bounds = array<i64: 8, 1>}, {pipeline_mode = #tpu.pipeline_mode<synchronous>, transform_indices = @transform_3, window_bounds = array<i64: 4, 8>}, {pipeline_mode = #tpu.pipeline_mode<synchronous>, transform_indices = @transform_4, window_bounds = array<i64: 4, 1>}, {transform_indices = @transform_5, window_bounds = array<i64: 1, 4, 256>}]} {
    %c0 = arith.constant 0 : index
    %c0_0 = arith.constant 0 : index
    %c0_1 = arith.constant 0 : index
    %0 = vector.load %arg1[%c0, %c0_0, %c0_1] : memref<1x4x256xf32, #tpu.memory_space<vmem>>, vector<1x4x256xf32>
    %1 = vector.shape_cast %0 : vector<1x4x256xf32> to vector<4x256xf32>
    %cst = arith.constant dense<0.000000e+00> : vector<4xf32>
    %2 = vector.multi_reduction <add>, %1, %cst [1] : vector<4x256xf32> to vector<4xf32>
    %3 = vector.shape_cast %2 : vector<4xf32> to vector<4x1xf32>
    %cst_2 = arith.constant 3.906250e-03 : f32
    %4 = vector.broadcast %cst_2 : f32 to vector<4x1xf32>
    %5 = arith.mulf %3, %4 : vector<4x1xf32>
    %c0_3 = arith.constant 0 : index
    %c0_4 = arith.constant 0 : index
    %6 = vector.load %arg2[%c0_3, %c0_4] : memref<8x4xf32, #tpu.memory_space<vmem>>, vector<8x4xf32>
    %cst_5 = arith.constant dense<0.000000e+00> : vector<8x1xf32>
    %7 = tpu.matmul %6, %5, %cst_5 {dimension_numbers = #tpu.dot_dimension_numbers<[1], [0], [0], [1], [0, 0, 1, 1], [], []>} : vector<8x4xf32>, vector<4x1xf32>, vector<8x1xf32> -> vector<8x1xf32>
    %c0_6 = arith.constant 0 : index
    %c0_7 = arith.constant 0 : index
    %8 = vector.load %arg3[%c0_6, %c0_7] : memref<8x1xf32, #tpu.memory_space<vmem>>, vector<8x1xf32>
    %9 = arith.addf %7, %8 : vector<8x1xf32>
    %cst_8 = arith.constant 0.000000e+00 : f32
    %10 = vector.broadcast %cst_8 : f32 to vector<8x1xf32>
    %11 = arith.maximumf %9, %10 : vector<8x1xf32>
    %c0_9 = arith.constant 0 : index
    %c0_10 = arith.constant 0 : index
    %12 = vector.load %arg4[%c0_9, %c0_10] : memref<4x8xf32, #tpu.memory_space<vmem>>, vector<4x8xf32>
    %cst_11 = arith.constant dense<0.000000e+00> : vector<4x1xf32>
    %13 = tpu.matmul %12, %11, %cst_11 {dimension_numbers = #tpu.dot_dimension_numbers<[1], [0], [0], [1], [0, 0, 1, 1], [], []>} : vector<4x8xf32>, vector<8x1xf32>, vector<4x1xf32> -> vector<4x1xf32>
    %c0_12 = arith.constant 0 : index
    %c0_13 = arith.constant 0 : index
    %14 = vector.load %arg5[%c0_12, %c0_13] : memref<4x1xf32, #tpu.memory_space<vmem>>, vector<4x1xf32>
    %15 = arith.addf %13, %14 : vector<4x1xf32>
    %cst_14 = arith.constant 3.000000e+00 : f32
    %16 = vector.broadcast %cst_14 : f32 to vector<4x1xf32>
    %17 = arith.addf %15, %16 : vector<4x1xf32>
    %cst_15 = arith.constant 0.000000e+00 : f32
    %cst_16 = arith.constant 6.000000e+00 : f32
    %18 = vector.broadcast %cst_15 : f32 to vector<4x1xf32>
    %19 = arith.maximumf %18, %17 : vector<4x1xf32>
    %20 = vector.broadcast %cst_16 : f32 to vector<4x1xf32>
    %21 = arith.minimumf %20, %19 : vector<4x1xf32>
    %cst_17 = arith.constant 0.166666672 : f32
    %22 = vector.broadcast %cst_17 : f32 to vector<4x1xf32>
    %23 = arith.mulf %21, %22 : vector<4x1xf32>
    %24 = vector.broadcast %23 : vector<4x1xf32> to vector<4x256xf32>
    %25 = arith.mulf %1, %24 : vector<4x256xf32>
    %c0_18 = arith.constant 0 : index
    %c0_19 = arith.constant 0 : index
    %c0_20 = arith.constant 0 : index
    %26 = vector.load %arg6[%c0_18, %c0_19, %c0_20] : memref<1x4x256xf32, #tpu.memory_space<vmem>>, vector<1x4x256xf32>
    %27 = vector.shape_cast %26 : vector<1x4x256xf32> to vector<4x256xf32>
    %28 = vector.shape_cast %25 : vector<4x256xf32> to vector<1x4x256xf32>
    tpu.vector_store %arg6[%c0_18, %c0_19, %c0_20], %28 {strides = array<i32>} : memref<1x4x256xf32, #tpu.memory_space<vmem>>, vector<1x4x256xf32>,
    return
  }
  func.func @transform_0(%arg0: i32) -> (i32, i32, i32) {
    %c0_i32 = arith.constant 0 : i32
    %c0_i32_0 = arith.constant 0 : i32
    %c0_i32_1 = arith.constant 0 : i32
    return %arg0, %c0_i32, %c0_i32_0 : i32, i32, i32
  }
  func.func @transform_1(%arg0: i32) -> (i32, i32) {
    %c0_i32 = arith.constant 0 : i32
    %c0_i32_0 = arith.constant 0 : i32
    %c0_i32_1 = arith.constant 0 : i32
    return %c0_i32, %c0_i32_0 : i32, i32
  }
  func.func @transform_2(%arg0: i32) -> (i32, i32) {
    %c0_i32 = arith.constant 0 : i32
    %c0_i32_0 = arith.constant 0 : i32
    %c0_i32_1 = arith.constant 0 : i32
    return %c0_i32, %c0_i32_0 : i32, i32
  }
  func.func @transform_3(%arg0: i32) -> (i32, i32) {
    %c0_i32 = arith.constant 0 : i32
    %c0_i32_0 = arith.constant 0 : i32
    %c0_i32_1 = arith.constant 0 : i32
    return %c0_i32, %c0_i32_0 : i32, i32
  }
  func.func @transform_4(%arg0: i32) -> (i32, i32) {
    %c0_i32 = arith.constant 0 : i32
    %c0_i32_0 = arith.constant 0 : i32
    %c0_i32_1 = arith.constant 0 : i32
    return %c0_i32, %c0_i32_0 : i32, i32
  }
  func.func @transform_5(%arg0: i32) -> (i32, i32, i32) {
    %c0_i32 = arith.constant 0 : i32
    %c0_i32_0 = arith.constant 0 : i32
    %c0_i32_1 = arith.constant 0 : i32
    return %arg0, %c0_i32, %c0_i32_0 : i32, i32, i32
  }
}

</mosaic_0001>

<bundles_post_ra>
// kernel: tpu_custom_call.1
= control target key start
LH: loop header
LB: loop body
LE: loop exit
PB: predicated region body
PF: predicated region fallthrough
CT: control target
= control target key end

     0   :  { %10 = vsyncpa [#allocation3], 0  ;;  %s757_s0 = inlined_call_operand.vmem [shape: f32[2,4,256], index: 0, kind: input, shape index: {}]   ;;  %s758_s1 = inlined_call_operand.vmem [shape: f32[8,4], index: 1, kind: input, shape index: {}]   ;;  %s759_s2 = inlined_call_operand.vmem [shape: f32[8,1], index: 2, kind: input, shape index: {}]   ;;  %s760_s3 = inlined_call_operand.vmem [shape: f32[4,8], index: 3, kind: input, shape index: {}]   ;;  %s761_s4 = inlined_call_operand.vmem [shape: f32[4,1], index: 4, kind: input, shape index: {}]   ;;  %s762_s5 = inlined_call_operand.hbm [shape: f32[2,4,256], index: 5, kind: output, shape index: {}]  }
   0x1   :  { %12 = vsyncpa [#allocation3 + $0x1], 0  ;;  %s655_s18 = smov 0   ;;  %s657_s19 = smov 0  }
   0x2   :  { %s659_s20 = smov 0   ;;  %s661_s21 = smov 0  }
   0x3 LB: > { %s676_s22 = sadd.s32 4294967295, %s618_s21   ;;  %s482_s23 = sadd.s32 4294967294, %s618_s21   ;;  %s618_s21 = sphi %s661_s21, %s768_s21   ;;  %s614_s20 = sphi %s659_s20, %s767_s20   ;;  %s610_s19 = sphi %s657_s19, %s766_s19   ;;  %s606_s18 = sphi %s655_s18, %s765_s18  }
   0x4   : > { %s680_s24 = sadd.s32 1, %s618_s21   ;;  %s135_s25 = sadd.s32 1, %s614_s20 }
   0x5   : > { %s132_s26 = ssub.s32 %s618_s21, %s680_s24  ;;  %p145_p0 = scmp.ne.s32.totalorder %s614_s20, %s610_s19 }
   0x6   : > { %p133_p1 = scmp.eq.s32.totalorder %s132_s26, 0  ;;  %p146_p2 = scmp.eq.s32.totalorder %s676_s22, 1 }
   0x7   : > { %p151_p3 = scmp.ne.s32.totalorder %s610_s19, %s606_s18  ;;  %p152_p4 = scmp.eq.s32.totalorder %s482_s23, 1 }
   0x8   : > { %s691_s27 = scalar_select %p133_p1, %s614_s20, %s135_s25  }
   0x9   : > { %p693_p5 = por %p146_p2, %p145_p0  ;;  %p697_p6 = por %p152_p4, %p151_p3 }
   0xa   : > { %p485_p7 = scmp.ge.s32.totalorder %s618_s21, 1  ;;  %p190_p8 = scmp.lt.s32.totalorder %s618_s21, 3 }
   0xc   : > { %p191_p9 = pnand %p485_p7, %p190_p8 }
   0xd   : > { %p218_p10 = scmp.lt.s32.totalorder (!%p191_p9), %s676_s22, 1  ;;  %s215_s23 = sand.u32 (!%p191_p9), 1, %s610_s19  }
   0xe   : > { %194 = sbr.rel (%p191_p9) target bundleno = 712 (0x2c8), region = 40  ;;  %s486_s25 = sshll.u32 (!%p191_p9), %s215_s23, 3 }
   0xf   : > { %s498_s26 = sshll.u32 (!%p191_p9), %s676_s22, 7  ;;  %s409_s10 = scalar_lea.sflag (!%p191_p9), [#allocation3], %s215_s23 }
  0x10   : > { %s624_s12 = smov (!%p191_p9), [#allocation2]  }
  0x11   : > { %s562_s13 = sshll.u32 (!%p191_p9), %s624_s12, 4  ;;  %s563_s13 = int_to_ptr.vmem [resolvable:$false] %s562_s13 }
  0x13   : > { %s219_s30 = scalar_select %p218_p10, %s676_s22, 1  ;;  %vm227_vm0 = vcmask 1043456   ;;  %v620_v5 = vmov 0.0   ;;  %vm621_vm1 = vmmov 0   ;;  %v234_v8 = vld [vmem:[%s758_s1] sm:$0xff]  ;;  %vm236_vm2 = vcmask 31744  }
  0x14   : > { %503 = vmatprep.subr.mxu0 %v620_v5  ;;  %508 = vmatprep.subr.mxu1 %v620_v5  ;;  %v235_v9 = vld [vmem:[%s759_s2] sm:$0xff]  ;;  %vm316_vm3 = vcmask 64512   ;;  %v622_v15 = vmov 0   ;;  %v623_v24 = vmov 839922192   ;;  %v401_v26 = vlaneseq  ;;  %s564_s22 = scalar_lea.vmem %s563_s13, 256 }
  0x15   : > { %s497_s6 = sshll.u32 %s219_s30, 3  ;;  %505 = vmatprep.mubr.msk.f32.mxu0 %vm621_vm1, %v620_v5  ;;  %510 = vmatprep.mubr.msk.f32.mxu1 %vm621_vm1, %v620_v5  ;;  %v314_v14 = vld [vmem:[%s760_s3] sm:$0xf]  ;;  %v399_v25 = vunpack.c.l.s4 %v623_v24  ;;  %s217_s30 = scalar_lea.vmem [#allocation2], %s486_s25 }
  0x16   : > { %s222_s9 = scalar_lea.vmem %s757_s0, %s497_s6  ;;  %556 = vset.pattern.permute.xlu0 %v622_v15  ;;  %v315_v16 = vld [vmem:[%s761_s4] sm:$0xf]  ;;  %v402_v28 = vshrl.u32 %v401_v26, 7  ;;  %s423_s6 = sshll.u32 %s217_s30, 4  ;;  %s424_s6 = int_to_ptr.vmem [resolvable:$true] %s423_s6 }
  0x17   : > { %v223_v0 = vld [vmem:[%s222_s9] sm:$0xff]  ;;  %v400_v27 = vunpack.c.0.s8 %v399_v25  ;;  %s421_s9 = scalar_lea.hbm %s762_s5, %s498_s26  ;;  %s558_s11 = scalar_lea.vmem %s424_s6, 128 }
  0x18   : > { %v225_v1 = vcombine.high %v223_v0, %v223_v0  ;;  %v228_v2 = vsel %vm227_vm0, %v223_v0, 0.0  ;;  %p559_p11 = scmp.ne.s32.totalorder %s424_s6, %s558_s11  ;;  %p565_p0 = scmp.lt.s32.totalorder %s424_s6, %s563_s13 }
  0x19   : > { %v403_v29 = vsub.s32 %v400_v27, %v402_v28  ;;  %p566_p1 = scmp.lt.s32.totalorder %s564_s22, %s558_s11 }
  0x1a   : > { %v229_v3 = vsel %vm227_vm0, %v225_v1, 0.0  ;;  %p560_p12 = pnand %p559_p11, %p693_p5 }
  0x1b   : > { %v230_v4 = vadd.f32 %v229_v3, %v228_v2  ;;  %p567_p2 = por %p566_p1, %p565_p0 }
  0x1c   : > { %p561_p13 = pneg %p560_p12 }
  0x1d   : > { %231 = vadd.xlane.f32.xlu0 %v230_v4 }
  0x1e   : > { %p568_p3 = pnand %p567_p2, %p561_p13 }
  0xa6   : > { %v232_v6 = vpop.xlane.xlu0 %231 }
  0xa7   : > { %v233_v7 = vmul.f32 0.00390625, %v232_v6 }
  0xa9   : > { %504 = vmatpush3.msk.msra.mxu0 %vm227_vm0, %v233_v7 }
  0xaa   : > { %506 = vmatmul.mubr.msk.f32.vlgmr.msra.gmra.mxu0 %vm236_vm2, %v234_v8 }
 0x16a   : > { %v309_v10 = vpop.f32.mrf.mxu0 }
 0x16b   : > { %v310_v11 = vadd.f32 %v309_v10, %v235_v9 }
 0x16c   : > { %v507_v12 = vpop.f32.mrf.mxu0 }
 0x16d   : > { %v313_v13 = vmax.f32 %v310_v11, 0.0 }
 0x16f   : > { %509 = vmatpush3.msra.mxu1 %v313_v13 }
 0x170   : > { %511 = vmatmul.mubr.msk.f32.vlgmr.msra.gmra.mxu1 %vm316_vm3, %v314_v14 }
 0x230   : > { %v386_v17 = vpop.f32.mrf.mxu1 }
 0x231   : > { %v387_v18 = vadd.f32 %v386_v17, %v315_v16 }
 0x232   : > { %v512_v19 = vpop.f32.mrf.mxu1 }
 0x233   : > { %v390_v20 = vadd.f32 3.0, %v387_v18 }
 0x235   : > { %v391_v21 = vmax.f32 %v390_v20, 0.0 }
 0x237   : > { %v392_v22 = vmin.f32 %v391_v21, 6.0 }
 0x239   : > { %v393_v23 = vmul.f32 0.16666667, %v392_v22 }
 0x23b   : > { %396 = vperm.xlu0 %556, %v393_v23  }
 0x2b6   : > { %v397_v30 = vpop.permute.xlu0 %396 }
 0x2b7   : > { %v404_v31 = vrot.slane %v397_v30, %v403_v29 }
 0x2b9   : > { %v406_v32 = vmul.f32 %v404_v31, %v223_v0 }
 0x2bb   : > { %407 = vst [vmem:[%s217_s30] sm:$0xff] %v406_v32 }
 0x2bc   : > { %571 = shalt.err (!%p568_p3)
}
 0x2bd   : > { %s572_s14 = scalar_lea.hbm %s421_s9, 128  ;;  %s576_s17 = scalar_lea.hbm %s762_s5, 256 }
 0x2be   : > { %p573_p4 = scmp.ne.s32.totalorder %s421_s9, %s572_s14  ;;  %p577_p9 = scmp.lt.s32.totalorder %s421_s9, %s762_s5 }
 0x2bf   : > { %p578_p10 = scmp.lt.s32.totalorder %s576_s17, %s572_s14 }
 0x2c0   : > { %p574_p7 = pnand %p573_p4, %p693_p5 }
 0x2c1   : > { %p579_p11 = por %p578_p10, %p577_p9 }
 0x2c2   : > { %p575_p8 = pneg %p574_p7 }
 0x2c4   : > { %p580_p12 = pnand %p579_p11, %p575_p8 }
 0x2c6   : > { %583 = shalt.err (!%p580_p12)
}
 0x2c7   : > { %513 = dma.vmem_to_hbm [thread:$0]  (%p693_p5), %s424_s6, 128, %s421_s9, %s409_s10  }
 0x2c8 PF: > { %p519_p13 = scmp.ge.s32.totalorder %s618_s21, 2  ;;  %s435_s26 = sand.u32 1, %s606_s18  }
 0x2c9   : > { %s436_s30 = scalar_lea.sflag [#allocation3], %s435_s26 }
 0x2ca   : > { %p516_p0 = pnand %p519_p13, %p697_p6 }
 0x2cc   : > { %p517_p1 = pneg %p516_p0 }
 0x2ce   : > { %601 = dma.done.wait (%p517_p1), %s436_s30, 128  }
 0x2cf   : > { %603 = vsyncadd (%p517_p1), %s436_s30, 4294967168  ;;  %p15_p2 = scmp.ge.s32.totalorder %s680_s24, 4   ;;  %s765_s18 = smov %s610_s19 }
 0x2d0   : > { %s766_s19 = smov %s614_s20  ;;  %s767_s20 = smov %s691_s27 }
 0x2d1   : > { %s768_s21 = smov %s680_s24  ;;  %17 = sbr.rel (!%p15_p2) target bundleno = 3 (0x3), region = 75 }
 0x2d6   :  { %441 = vsyncpa [#allocation3], 1 }
 0x2d7   :  { %443 = vsyncpa [#allocation3 + $0x1], 1 }

</bundles_post_ra>
